<compile_context>
chip_gen: v7x
topology: tpu7x:2x2x1
jax: 0.10.0
libtpu: 0.0.40
codegen_flags: <defaults>
</compile_context>

<pallas_src>
import functools

import jax
import jax.numpy as jnp
from jax.experimental import pallas as pl
from jax.experimental.pallas import tpu as pltpu


def _view_max_kernel(x_ref, w_ref, bias_ref, pooled_ref, aux_ref, acc_ref, *,
                     inv_dhw, bb, dhw, dhw_tile, needs_mask):
    # x_ref:      (bb, V, C, dhw_tile)  bb batches, all views, one spatial tile
    # w_ref:      (C, F)                linear weight
    # bias_ref:   (1, F)                linear bias
    # pooled_ref: (bb, 1, F)            per-batch-block output (max over views)
    # aux_ref:    (bb, V, F)            per-batch-block output (per-view features)
    # acc_ref:    (bb, V, C) f32        partial spatial sums, resident across s
    s = pl.program_id(1)
    n_s = pl.num_programs(1)

    @pl.when(s == 0)
    def _():
        acc_ref[...] = jnp.zeros_like(acc_ref)

    # Lane-axis partial sum over the DHW tile (full 128-lane vregs).
    if needs_mask:
        lane = jax.lax.broadcasted_iota(jnp.int32, x_ref.shape[1:], dimension=2)
        valid = lane < (dhw - s * dhw_tile)          # all-true except on the tail block
    for i in range(bb):                              # bb is a small static constant
        xi = x_ref[i]                                # (V, C, dhw_tile)
        if needs_mask:
            xi = jnp.where(valid, xi, 0.0)
        acc_ref[i] += jnp.sum(xi, axis=-1)           # (V, C)

    @pl.when(s == n_s - 1)
    def _():
        w = w_ref[...]                               # (C, F)
        b = bias_ref[...]                            # (1, F)
        for i in range(bb):
            mean_i = acc_ref[i] * inv_dhw            # (V, C) global avg pool
            feats = jnp.dot(mean_i, w,
                            preferred_element_type=jnp.float32) + b       # (V, F)
            aux_ref[i] = feats
            pooled_ref[i] = jnp.max(feats, axis=0, keepdims=True)         # (1, F)


def _choose_tiling(B, V, C, DHW, *, budget_bytes, max_bb):
    """Pick (batch block bb, spatial tile) so the input block fits the VMEM budget."""
    row_bytes = V * C * 4
    full_bytes = row_bytes * DHW
    if full_bytes <= budget_bytes:
        # Whole DHW fits: block as many batches per grid step as allowed.
        bb = 1
        for cand in range(min(B, max_bb), 0, -1):
            if B % cand == 0 and cand * full_bytes <= budget_bytes:
                bb = cand
                break
        return bb, DHW
    # One batch at a time; tile DHW along the lane axis in multiples of 128.
    tile = None
    t = 128
    while t * row_bytes <= budget_bytes and t <= DHW:
        if DHW % t == 0:
            tile = t
        t += 128
    if tile is None:
        # No 128-multiple divisor under budget: ceil-div tiling + masked tail.
        tile = max(128, (budget_bytes // row_bytes) // 128 * 128)
        tile = min(tile, pl.cdiv(DHW, 128) * 128)
    return 1, tile


def view_max_aggregate(mvimages, weight, bias, *, block_budget_bytes=8 << 20,
                       max_batch_block=8):
    """mvimages: (B, V, C, D, H, W) float32; weight: (C, F); bias: (F,)."""
    B, V, C, D, H, W = mvimages.shape
    F = weight.shape[1]
    DHW = D * H * W

    # Contiguous-dim merge only (no transpose, no extra HBM pass).
    x = mvimages.reshape(B, V, C, DHW)
    bias2d = bias.reshape(1, F)

    bb, dhw_tile = _choose_tiling(B, V, C, DHW, budget_bytes=block_budget_bytes,
                                  max_bb=max_batch_block)
    n_b = B // bb
    n_s = pl.cdiv(DHW, dhw_tile)
    needs_mask = (DHW % dhw_tile) != 0

    # VMEM budget: the x block is double-buffered; params/outputs/scratch are tiny.
    x_block_bytes = bb * V * C * dhw_tile * 4
    side_bytes = (C * F + F + bb * F + bb * V * F + bb * V * C) * 4
    vmem_limit = int(min(64 << 20,
                         max(16 << 20, 2 * x_block_bytes + 4 * side_bytes + (4 << 20))))

    flops = B * V * C * DHW + 2 * B * V * C * F + B * V * F
    bytes_accessed = 4 * (B * V * C * DHW + C * F + F + B * F + B * V * F)

    kernel = functools.partial(_view_max_kernel, inv_dhw=1.0 / DHW, bb=bb,
                               dhw=DHW, dhw_tile=dhw_tile, needs_mask=needs_mask)

    pooled3, aux = pl.pallas_call(
        kernel,
        out_shape=(
            jax.ShapeDtypeStruct((B, 1, F), jnp.float32),   # pooled (max over views)
            jax.ShapeDtypeStruct((B, V, F), jnp.float32),   # aux (per-view features)
        ),
        grid_spec=pltpu.PrefetchScalarGridSpec(
            num_scalar_prefetch=0,
            grid=(n_b, n_s),
            in_specs=[
                pl.BlockSpec((bb, V, C, dhw_tile), lambda b, s: (b, 0, 0, s)),
                pl.BlockSpec((C, F), lambda b, s: (0, 0)),
                pl.BlockSpec((1, F), lambda b, s: (0, 0)),
            ],
            out_specs=[
                pl.BlockSpec((bb, 1, F), lambda b, s: (b, 0, 0)),
                pl.BlockSpec((bb, V, F), lambda b, s: (b, 0, 0)),
            ],
            scratch_shapes=[pltpu.VMEM((bb, V, C), jnp.float32)],
        ),
        compiler_params=pltpu.CompilerParams(
            dimension_semantics=("parallel", "arbitrary"),   # B shardable on v7x megacore
            vmem_limit_bytes=vmem_limit),
        cost_estimate=pl.CostEstimate(
            flops=flops, transcendentals=0, bytes_accessed=bytes_accessed),
    )(x, weight, bias2d)

    pooled = pooled3.reshape(B, F)
    # Note: jnp.squeeze matches torch .squeeze() — drops ALL unit dims (B==1 foot-gun).
    return jnp.squeeze(pooled), aux


def _reference(mvimages, weight, bias):
    # Pure-JAX reference of the same forward pass.
    feats = jnp.mean(mvimages, axis=(3, 4, 5))              # (B, V, C)
    aux = jnp.einsum("bvc,cf->bvf", feats, weight) + bias   # (B, V, F)
    pooled = jnp.max(aux, axis=1)                           # (B, F)
    return jnp.squeeze(pooled), aux


if __name__ == "__main__":
    key = jax.random.PRNGKey(0)
    B, V, C, D, H, W = 2, 3, 4, 4, 8, 8
    F = 128  # feature dim of the synthetic backbone head

    k_x, k_w, k_b = jax.random.split(key, 3)
    mvimages = jax.random.normal(k_x, (B, V, C, D, H, W), dtype=jnp.float32)
    weight = jax.random.normal(k_w, (C, F), dtype=jnp.float32) * 0.1
    bias = jax.random.normal(k_b, (F,), dtype=jnp.float32) * 0.01

    pooled_ref, aux_ref = _reference(mvimages, weight, bias)

    # 1) Default path: whole DHW in one tile, multiple batches per grid step.
    pooled, aux = view_max_aggregate(mvimages, weight, bias)
    jax.block_until_ready((pooled, aux))
    assert pooled.shape == pooled_ref.shape and aux.shape == (B, V, F)
    assert jnp.allclose(pooled, pooled_ref, atol=1e-4, rtol=1e-4)
    assert jnp.allclose(aux, aux_ref, atol=1e-4, rtol=1e-4)

    # 2) Spatial-tiled path: small budget forces bb=1 and a 2-step DHW reduction.
    pooled_t, aux_t = view_max_aggregate(mvimages, weight, bias,
                                         block_budget_bytes=8192)
    jax.block_until_ready((pooled_t, aux_t))
    assert jnp.allclose(pooled_t, pooled_ref, atol=1e-4, rtol=1e-4)
    assert jnp.allclose(aux_t, aux_ref, atol=1e-4, rtol=1e-4)

    # 3) Masked-tail path: DHW = 320 is not a multiple of the 128-lane tile.
    D2, H2, W2 = 4, 8, 10
    mv2 = jax.random.normal(key, (B, V, C, D2, H2, W2), dtype=jnp.float32)
    pooled_mref, aux_mref = _reference(mv2, weight, bias)
    pooled_m, aux_m = view_max_aggregate(mv2, weight, bias,
                                         block_budget_bytes=8192)
    jax.block_until_ready((pooled_m, aux_m))
    assert jnp.allclose(pooled_m, pooled_mref, atol=1e-4, rtol=1e-4)
    assert jnp.allclose(aux_m, aux_mref, atol=1e-4, rtol=1e-4)

    print("KERNEL_OK")
</pallas_src>

<mosaic_0001>
module attributes {stable_mosaic.version = 11 : i64} {
  func.func @_view_max_kernel(%arg0: i32, %arg1: i32, %arg2: memref<2x3x4x256xf32, #tpu.memory_space<vmem>>, %arg3: memref<4x128xf32, #tpu.memory_space<vmem>>, %arg4: memref<1x128xf32, #tpu.memory_space<vmem>>, %arg5: memref<2x1x128xf32, #tpu.memory_space<vmem>>, %arg6: memref<2x3x128xf32, #tpu.memory_space<vmem>>, %arg7: memref<2x3x4xf32, #tpu.memory_space<vmem>>) attributes {dimension_semantics = [#tpu.dimension_semantics<parallel>, #tpu.dimension_semantics<arbitrary>], iteration_bounds = array<i64: 1, 1>, scalar_prefetch = 0 : i64, scratch_operands = 1 : i64, tpu.core_type = #tpu.core_type<tc>, window_params = [{transform_indices = @transform_0, window_bounds = array<i64: 2, 3, 4, 256>}, {pipeline_mode = #tpu.pipeline_mode<synchronous>, transform_indices = @transform_1, window_bounds = array<i64: 4, 128>}, {pipeline_mode = #tpu.pipeline_mode<synchronous>, transform_indices = @transform_2, window_bounds = array<i64: 1, 128>}, {transform_indices = @transform_3, window_bounds = array<i64: 2, 1, 128>}, {transform_indices = @transform_4, window_bounds = array<i64: 2, 3, 128>}]} {
    %c0_i32 = arith.constant 0 : i32
    %0 = arith.cmpi eq, %arg1, %c0_i32 : i32
    %1 = arith.extui %0 : i1 to i32
    %c0_i32_0 = arith.constant 0 : i32
    %2 = arith.cmpi ne, %1, %c0_i32_0 : i32
    scf.if %2 {
      %cst_22 = arith.constant 0.000000e+00 : f32
      %24 = vector.broadcast %cst_22 : f32 to vector<2x3x4xf32>
      %c0_23 = arith.constant 0 : index
      %c0_24 = arith.constant 0 : index
      %c0_25 = arith.constant 0 : index
      %25 = vector.load %arg7[%c0_23, %c0_24, %c0_25] : memref<2x3x4xf32, #tpu.memory_space<vmem>>, vector<2x3x4xf32>
      tpu.vector_store %arg7[%c0_23, %c0_24, %c0_25], %24 {strides = array<i32>} : memref<2x3x4xf32, #tpu.memory_space<vmem>>, vector<2x3x4xf32>,
    } else {
    }
    %c0 = arith.constant 0 : index
    %c0_1 = arith.constant 0 : index
    %c0_2 = arith.constant 0 : index
    %c0_3 = arith.constant 0 : index
    %3 = vector.load %arg2[%c0, %c0_1, %c0_2, %c0_3] : memref<2x3x4x256xf32, #tpu.memory_space<vmem>>, vector<1x3x4x256xf32>
    %4 = vector.shape_cast %3 : vector<1x3x4x256xf32> to vector<3x4x256xf32>
    %c0_4 = arith.constant 0 : index
    %c0_5 = arith.constant 0 : index
    %c0_6 = arith.constant 0 : index
    %5 = vector.load %arg7[%c0_4, %c0_5, %c0_6] : memref<2x3x4xf32, #tpu.memory_space<vmem>>, vector<1x3x4xf32>
    %6 = vector.shape_cast %5 : vector<1x3x4xf32> to vector<3x4xf32>
    %cst = arith.constant dense<0.000000e+00> : vector<3x4xf32>
    %7 = vector.multi_reduction <add>, %4, %cst [2] : vector<3x4x256xf32> to vector<3x4xf32>
    %8 = arith.addf %6, %7 : vector<3x4xf32>
    %c0_7 = arith.constant 0 : index
    %c0_8 = arith.constant 0 : index
    %c0_9 = arith.constant 0 : index
    %9 = vector.load %arg7[%c0_7, %c0_8, %c0_9] : memref<2x3x4xf32, #tpu.memory_space<vmem>>, vector<1x3x4xf32>
    %10 = vector.shape_cast %9 : vector<1x3x4xf32> to vector<3x4xf32>
    %11 = vector.shape_cast %8 : vector<3x4xf32> to vector<1x3x4xf32>
    tpu.vector_store %arg7[%c0_7, %c0_8, %c0_9], %11 {strides = array<i32>} : memref<2x3x4xf32, #tpu.memory_space<vmem>>, vector<1x3x4xf32>,
    %c1 = arith.constant 1 : index
    %c0_10 = arith.constant 0 : index
    %c0_11 = arith.constant 0 : index
    %c0_12 = arith.constant 0 : index
    %12 = vector.load %arg2[%c1, %c0_10, %c0_11, %c0_12] : memref<2x3x4x256xf32, #tpu.memory_space<vmem>>, vector<1x3x4x256xf32>
    %13 = vector.shape_cast %12 : vector<1x3x4x256xf32> to vector<3x4x256xf32>
    %c1_13 = arith.constant 1 : index
    %c0_14 = arith.constant 0 : index
    %c0_15 = arith.constant 0 : index
    %14 = vector.load %arg7[%c1_13, %c0_14, %c0_15] : memref<2x3x4xf32, #tpu.memory_space<vmem>>, vector<1x3x4xf32>
    %15 = vector.shape_cast %14 : vector<1x3x4xf32> to vector<3x4xf32>
    %cst_16 = arith.constant dense<0.000000e+00> : vector<3x4xf32>
    %16 = vector.multi_reduction <add>, %13, %cst_16 [2] : vector<3x4x256xf32> to vector<3x4xf32>
    %17 = arith.addf %15, %16 : vector<3x4xf32>
    %c1_17 = arith.constant 1 : index
    %c0_18 = arith.constant 0 : index
    %c0_19 = arith.constant 0 : index
    %18 = vector.load %arg7[%c1_17, %c0_18, %c0_19] : memref<2x3x4xf32, #tpu.memory_space<vmem>>, vector<1x3x4xf32>
    %19 = vector.shape_cast %18 : vector<1x3x4xf32> to vector<3x4xf32>
    %20 = vector.shape_cast %17 : vector<3x4xf32> to vector<1x3x4xf32>
    tpu.vector_store %arg7[%c1_17, %c0_18, %c0_19], %20 {strides = array<i32>} : memref<2x3x4xf32, #tpu.memory_space<vmem>>, vector<1x3x4xf32>,
    %c0_i32_20 = arith.constant 0 : i32
    %21 = arith.cmpi eq, %arg1, %c0_i32_20 : i32
    %22 = arith.extui %21 : i1 to i32
    %c0_i32_21 = arith.constant 0 : i32
    %23 = arith.cmpi ne, %22, %c0_i32_21 : i32
    scf.if %23 {
      %c0_22 = arith.constant 0 : index
      %c0_23 = arith.constant 0 : index
      %24 = vector.load %arg3[%c0_22, %c0_23] : memref<4x128xf32, #tpu.memory_space<vmem>>, vector<4x128xf32>
      %c0_24 = arith.constant 0 : index
      %c0_25 = arith.constant 0 : index
      %25 = vector.load %arg4[%c0_24, %c0_25] : memref<1x128xf32, #tpu.memory_space<vmem>>, vector<1x128xf32>
      %c0_26 = arith.constant 0 : index
      %c0_27 = arith.constant 0 : index
      %c0_28 = arith.constant 0 : index
      %26 = vector.load %arg7[%c0_26, %c0_27, %c0_28] : memref<2x3x4xf32, #tpu.memory_space<vmem>>, vector<1x3x4xf32>
      %27 = vector.shape_cast %26 : vector<1x3x4xf32> to vector<3x4xf32>
      %cst_29 = arith.constant 3.906250e-03 : f32
      %28 = vector.broadcast %cst_29 : f32 to vector<3x4xf32>
      %29 = arith.mulf %27, %28 : vector<3x4xf32>
      %cst_30 = arith.constant dense<0.000000e+00> : vector<3x128xf32>
      %30 = tpu.matmul %29, %24, %cst_30 {dimension_numbers = #tpu.dot_dimension_numbers<[1], [0], [0], [1], [0, 0, 1, 1], [], []>} : vector<3x4xf32>, vector<4x128xf32>, vector<3x128xf32> -> vector<3x128xf32>
      %31 = vector.broadcast %25 : vector<1x128xf32> to vector<3x128xf32>
      %32 = arith.addf %30, %31 : vector<3x128xf32>
      %c0_31 = arith.constant 0 : index
      %c0_32 = arith.constant 0 : index
      %c0_33 = arith.constant 0 : index
      %33 = vector.load %arg6[%c0_31, %c0_32, %c0_33] : memref<2x3x128xf32, #tpu.memory_space<vmem>>, vector<1x3x128xf32>
      %34 = vector.shape_cast %33 : vector<1x3x128xf32> to vector<3x128xf32>
      %35 = vector.shape_cast %32 : vector<3x128xf32> to vector<1x3x128xf32>
      tpu.vector_store %arg6[%c0_31, %c0_32, %c0_33], %35 {strides = array<i32>} : memref<2x3x128xf32, #tpu.memory_space<vmem>>, vector<1x3x128xf32>,
      %cst_34 = arith.constant dense<0xFF800000> : vector<128xf32>
      %36 = vector.multi_reduction <maximumf>, %32, %cst_34 [0] : vector<3x128xf32> to vector<128xf32>
      %37 = vector.shape_cast %36 : vector<128xf32> to vector<1x128xf32>
      %c0_35 = arith.constant 0 : index
      %c0_36 = arith.constant 0 : index
      %c0_37 = arith.constant 0 : index
      %38 = vector.load %arg5[%c0_35, %c0_36, %c0_37] : memref<2x1x128xf32, #tpu.memory_space<vmem>>, vector<1x1x128xf32>
      %39 = vector.shape_cast %38 : vector<1x1x128xf32> to vector<1x128xf32>
      %40 = vector.shape_cast %37 : vector<1x128xf32> to vector<1x1x128xf32>
      tpu.vector_store %arg5[%c0_35, %c0_36, %c0_37], %40 {strides = array<i32>} : memref<2x1x128xf32, #tpu.memory_space<vmem>>, vector<1x1x128xf32>,
      %c1_38 = arith.constant 1 : index
      %c0_39 = arith.constant 0 : index
      %c0_40 = arith.constant 0 : index
      %41 = vector.load %arg7[%c1_38, %c0_39, %c0_40] : memref<2x3x4xf32, #tpu.memory_space<vmem>>, vector<1x3x4xf32>
      %42 = vector.shape_cast %41 : vector<1x3x4xf32> to vector<3x4xf32>
      %cst_41 = arith.constant 3.906250e-03 : f32
      %43 = vector.broadcast %cst_41 : f32 to vector<3x4xf32>
      %44 = arith.mulf %42, %43 : vector<3x4xf32>
      %cst_42 = arith.constant dense<0.000000e+00> : vector<3x128xf32>
      %45 = tpu.matmul %44, %24, %cst_42 {dimension_numbers = #tpu.dot_dimension_numbers<[1], [0], [0], [1], [0, 0, 1, 1], [], []>} : vector<3x4xf32>, vector<4x128xf32>, vector<3x128xf32> -> vector<3x128xf32>
      %46 = vector.broadcast %25 : vector<1x128xf32> to vector<3x128xf32>
      %47 = arith.addf %45, %46 : vector<3x128xf32>
      %c1_43 = arith.constant 1 : index
      %c0_44 = arith.constant 0 : index
      %c0_45 = arith.constant 0 : index
      %48 = vector.load %arg6[%c1_43, %c0_44, %c0_45] : memref<2x3x128xf32, #tpu.memory_space<vmem>>, vector<1x3x128xf32>
      %49 = vector.shape_cast %48 : vector<1x3x128xf32> to vector<3x128xf32>
      %50 = vector.shape_cast %47 : vector<3x128xf32> to vector<1x3x128xf32>
      tpu.vector_store %arg6[%c1_43, %c0_44, %c0_45], %50 {strides = array<i32>} : memref<2x3x128xf32, #tpu.memory_space<vmem>>, vector<1x3x128xf32>,
      %cst_46 = arith.constant dense<0xFF800000> : vector<128xf32>
      %51 = vector.multi_reduction <maximumf>, %47, %cst_46 [0] : vector<3x128xf32> to vector<128xf32>
      %52 = vector.shape_cast %51 : vector<128xf32> to vector<1x128xf32>
      %c1_47 = arith.constant 1 : index
      %c0_48 = arith.constant 0 : index
      %c0_49 = arith.constant 0 : index
      %53 = vector.load %arg5[%c1_47, %c0_48, %c0_49] : memref<2x1x128xf32, #tpu.memory_space<vmem>>, vector<1x1x128xf32>
      %54 = vector.shape_cast %53 : vector<1x1x128xf32> to vector<1x128xf32>
      %55 = vector.shape_cast %52 : vector<1x128xf32> to vector<1x1x128xf32>
      tpu.vector_store %arg5[%c1_47, %c0_48, %c0_49], %55 {strides = array<i32>} : memref<2x1x128xf32, #tpu.memory_space<vmem>>, vector<1x1x128xf32>,
    } else {
    }
    return
  }
  func.func @transform_0(%arg0: i32, %arg1: i32) -> (i32, i32, i32, i32) {
    %c0_i32 = arith.constant 0 : i32
    %c0_i32_0 = arith.constant 0 : i32
    %c0_i32_1 = arith.constant 0 : i32
    return %arg0, %c0_i32, %c0_i32_0, %arg1 : i32, i32, i32, i32
  }
  func.func @transform_1(%arg0: i32, %arg1: i32) -> (i32, i32) {
    %c0_i32 = arith.constant 0 : i32
    %c0_i32_0 = arith.constant 0 : i32
    %c0_i32_1 = arith.constant 0 : i32
    return %c0_i32, %c0_i32_0 : i32, i32
  }
  func.func @transform_2(%arg0: i32, %arg1: i32) -> (i32, i32) {
    %c0_i32 = arith.constant 0 : i32
    %c0_i32_0 = arith.constant 0 : i32
    %c0_i32_1 = arith.constant 0 : i32
    return %c0_i32, %c0_i32_0 : i32, i32
  }
  func.func @transform_3(%arg0: i32, %arg1: i32) -> (i32, i32, i32) {
    %c0_i32 = arith.constant 0 : i32
    %c0_i32_0 = arith.constant 0 : i32
    %c0_i32_1 = arith.constant 0 : i32
    return %arg0, %c0_i32, %c0_i32_0 : i32, i32, i32
  }
  func.func @transform_4(%arg0: i32, %arg1: i32) -> (i32, i32, i32) {
    %c0_i32 = arith.constant 0 : i32
    %c0_i32_0 = arith.constant 0 : i32
    %c0_i32_1 = arith.constant 0 : i32
    return %arg0, %c0_i32, %c0_i32_0 : i32, i32, i32
  }
}

</mosaic_0001>

<bundles_post_ra>
// kernel: tpu_custom_call.1
= control target key start
LH: loop header
LB: loop body
LE: loop exit
PB: predicated region body
PF: predicated region fallthrough
CT: control target
= control target key end

     0   :  { %10 = vsyncpa [#allocation4], 0  ;;  %s566_s0 = inlined_call_operand.hbm [shape: f32[2,3,4,256], index: 0, kind: input, shape index: {}]   ;;  %s567_s1 = inlined_call_operand.hbm [shape: f32[4,128], index: 1, kind: input, shape index: {}]   ;;  %s568_s2 = inlined_call_operand.vmem [shape: f32[1,128], index: 2, kind: input, shape index: {}]   ;;  %s569_s3 = inlined_call_operand.hbm [shape: f32[2,1,128], index: 3, kind: output, shape index: {0}]   ;;  %s570_s4 = inlined_call_operand.vmem [shape: f32[2,3,128], index: 4, kind: output, shape index: {1}]  }
   0x1   :  { %11 = vsyncpa [#allocation7], 0 }
   0x2   :  { %12 = vsyncpa [#allocation5], 0  ;;  %s469_s15 = smov [#allocation3]   ;;  %s397_s19 = scalar_lea.hbm %s566_s0, 768 }
   0x3   :  { %s18_s16 = sshll.u32 %s469_s15, 4  ;;  %p398_p0 = scmp.ne.s32.totalorder %s566_s0, %s397_s19  ;;  %s19_s16 = int_to_ptr.vmem [resolvable:$true] %s18_s16 }
   0x4   :  { %p401_p1 = scmp.lt.u32.totalorder %s397_s19, %s566_s0 }
   0x6   :  { %p403_p2 = pnand %p401_p1, %p398_p0 }
   0x8   :  { %406 = shalt.err (!%p403_p2)
}
   0x9   :  { %s407_s24 = scalar_lea.vmem %s19_s16, 768  ;;  %p412_p4 = scmp.lt.s32.totalorder %s19_s16, %s19_s16 }
   0xa   :  { %p408_p3 = scmp.ne.s32.totalorder %s19_s16, %s407_s24  ;;  %p413_p5 = scmp.lt.s32.totalorder %s407_s24, %s407_s24 }
   0xc   :  { %p414_p6 = por %p413_p5, %p412_p4 }
   0xe   :  { %p415_p7 = pnand %p414_p6, %p408_p3 }
  0x10   :  { %418 = shalt.err (!%p415_p7)
}
  0x11   :  { %s470_s25 = smov 128   ;;  %s471_s26 = smov 8  }
  0x12   :  { %24 = dma.hbm_to_vmem [thread:$0]  %s566_s0, 768, %s19_s16, [#allocation4], %s470_s25, %s470_s25, %s471_s26  }
  0x13   :  { %s472_s29 = smov [#allocation6]   ;;  %s419_s7 = scalar_lea.hbm %s567_s1, 64 }
  0x14   :  { %s31_s30 = sshll.u32 %s472_s29, 4  ;;  %p420_p8 = scmp.ne.s32.totalorder %s567_s1, %s419_s7  ;;  %s32_s30 = int_to_ptr.vmem [resolvable:$true] %s31_s30 }
  0x15   :  { %p423_p9 = scmp.lt.u32.totalorder %s419_s7, %s567_s1 }
  0x17   :  { %p425_p10 = pnand %p423_p9, %p420_p8 }
  0x19   :  { %428 = shalt.err (!%p425_p10)
}
  0x1a   :  { %s429_s12 = scalar_lea.vmem %s32_s30, 64  ;;  %p434_p12 = scmp.lt.s32.totalorder %s32_s30, %s32_s30 }
  0x1b   :  { %p430_p11 = scmp.ne.s32.totalorder %s32_s30, %s429_s12  ;;  %p435_p13 = scmp.lt.s32.totalorder %s429_s12, %s429_s12 }
  0x1d   :  { %p436_p0 = por %p435_p13, %p434_p12 }
  0x1f   :  { %p437_p1 = pnand %p436_p0, %p430_p11 }
  0x21   :  { %440 = shalt.err (!%p437_p1)
}
  0x22   :  { %34 = dma.hbm_to_vmem [thread:$0]  %s567_s1, 64, %s32_s30, [#allocation7]  }
  0x23   :  { %463 = dma.done.wait [#allocation4], 768  }
  0x24   :  { %464 = vsyncadd [#allocation4], 4294966528 }
  0x25   :  { %465 = dma.done.wait [#allocation7], 64  }
  0x26   :  { %466 = vsyncadd [#allocation7], 4294967232  ;;  %vm63_vm0 = vcmask 1043456   ;;  %v105_v0 = vld [vmem:[#allocation3 + $0x18] sm:$0xff]  ;;  %v50_v1 = vld [vmem:[#allocation3] sm:$0xff]  ;;  %vm47_vm1 = vcmask 26624   ;;  %v82_v32 = vlaneseq }
  0x27   :  { %v106_v2 = vld [vmem:[#allocation3 + $0x20] sm:$0xff]  ;;  %v113_v3 = vcombine.high %v105_v0, %v105_v0  ;;  %v119_v4 = vsel %vm63_vm0, %v105_v0, 0.0  ;;  %v57_v5 = vcombine.high %v50_v1, %v50_v1  ;;  %v64_v6 = vsel %vm63_vm0, %v50_v1, 0.0  ;;  %v51_v7 = vld [vmem:[#allocation3 + $0x8] sm:$0xff]  ;;  %v52_v12 = vld [vmem:[#allocation3 + $0x10] sm:$0xff] }
  0x28   :  { %v107_v8 = vld [vmem:[#allocation3 + $0x28] sm:$0xff]  ;;  %v114_v9 = vcombine.high %v106_v2, %v106_v2  ;;  %v124_v10 = vsel %vm63_vm0, %v106_v2, 0.0  ;;  %v58_v11 = vcombine.high %v51_v7, %v51_v7  ;;  %v69_v15 = vsel %vm63_vm0, %v51_v7, 0.0  ;;  %v157_v31 = vld [vmem:[#allocation6] sm:$0xf] }
  0x29   :  { %v120_v13 = vsel %vm63_vm0, %v113_v3, 0.0  ;;  %v65_v14 = vsel %vm63_vm0, %v57_v5, 0.0  ;;  %v115_v16 = vcombine.high %v107_v8, %v107_v8  ;;  %v59_v21 = vcombine.high %v52_v12, %v52_v12  ;;  %v362_v60 = vld [vmem:[%s568_s2] ss:$0 sm:$0xff]  ;;  %s475_s2 = smov [#allocation8]  }
  0x2a   :  { %v121_v17 = vadd.f32 %v120_v13, %v119_v4  ;;  %v66_v18 = vadd.f32 %v65_v14, %v64_v6  ;;  %v125_v19 = vsel %vm63_vm0, %v114_v9, 0.0  ;;  %v70_v20 = vsel %vm63_vm0, %v58_v11, 0.0  ;;  %s345_s19 = sshll.u32 %s475_s2, 4  ;;  %s346_s19 = int_to_ptr.vmem [resolvable:$true] %s345_s19 }
  0x2b   :  { %v126_v22 = vadd.f32 %v125_v19, %v124_v10  ;;  %v71_v23 = vadd.f32 %v70_v20, %v69_v15  ;;  %v129_v24 = vsel %vm63_vm0, %v107_v8, 0.0  ;;  %v130_v25 = vsel %vm63_vm0, %v115_v16, 0.0  ;;  %s441_s20 = scalar_lea.vmem %s346_s19, 32  ;;  %p446_p3 = scmp.lt.s32.totalorder %s346_s19, %s346_s19 }
  0x2c   :  { %122 = vadd.xlane.f32.xlu1 %v121_v17  ;;  %67 = vadd.xlane.f32.xlu0 %v66_v18  ;;  %v74_v26 = vsel %vm63_vm0, %v52_v12, 0.0  ;;  %v75_v27 = vsel %vm63_vm0, %v59_v21, 0.0  ;;  %v131_v28 = vadd.f32 %v130_v25, %v129_v24  ;;  %v473_v30 = vmov 0.0   ;;  %p442_p2 = scmp.ne.s32.totalorder %s346_s19, %s441_s20  ;;  %p447_p4 = scmp.lt.s32.totalorder %s441_s20, %s441_s20 }
  0x2d   :  { %v76_v29 = vadd.f32 %v75_v27, %v74_v26  ;;  %49 = vst.msk [vmem:[#allocation2 + $0x4] sm:$0x7] %vm47_vm1, %v473_v30  ;;  %48 = vst.msk [vmem:[#allocation2] sm:$0x7] %vm47_vm1, %v473_v30  ;;  %372 = vmatprep.subr.mxu0 %v473_v30  ;;  %377 = vmatprep.subr.mxu1 %v473_v30  ;;  %vm474_vm2 = vmmov 0   ;;  %v83_v33 = vand.u32 127, %v82_v32 }
  0x2e   :  { %373 = vmatpush3.msk.msra.mxu0 %vm63_vm0, %v157_v31  ;;  %374 = vmatprep.mubr.msk.f32.mxu0 %vm474_vm2, %v473_v30  ;;  %v85_v34 = vshrl.u32 %v82_v32, 7  ;;  %vm96_vm3 = vcmask 1041409   ;;  %vm98_vm4 = vcmask 1042434   ;;  %vm167_vm5 = vcmask 31744   ;;  %p448_p5 = por %p447_p4, %p446_p3 }
  0x2f   :  { %378 = vmatpush3.msk.msra.mxu1 %vm63_vm0, %v157_v31  ;;  %379 = vmatprep.mubr.msk.f32.mxu1 %vm474_vm2, %v473_v30  ;;  %vm245_vm6 = vcmask 1042432  }
  0x30   :  { %127 = vadd.xlane.f32.xlu1 %v126_v22  ;;  %72 = vadd.xlane.f32.xlu0 %v71_v23  ;;  %v86_v37 = vsub.s32 %v83_v33, %v85_v34  ;;  %p449_p6 = pnand %p448_p5, %p442_p2 }
  0x34   :  { %132 = vadd.xlane.f32.xlu1 %v131_v28  ;;  %77 = vadd.xlane.f32.xlu0 %v76_v29  ;;  %v109_v46 = vld [vmem:[#allocation2 + $0x4] sm:$0x7]  ;;  %v53_v48 = vld [vmem:[#allocation2] sm:$0x7] }
  0xb9   :  { %v123_v35 = vpop.xlane.xlu1 %122  ;;  %v68_v36 = vpop.xlane.xlu0 %67 }
  0xba   :  { %v140_v42 = vrot.slane %v123_v35, %v86_v37  ;;  %v87_v43 = vrot.slane %v68_v36, %v86_v37 }
  0xbd   :  { %v128_v38 = vpop.xlane.xlu1 %127  ;;  %v73_v39 = vpop.xlane.xlu0 %72 }
  0xbe   :  { %v144_v40 = vrot.slane %v128_v38, %v86_v37  ;;  %v91_v41 = vrot.slane %v73_v39, %v86_v37 }
  0xc0   :  { %v149_v50 = vsel %vm96_vm3, %v144_v40, %v140_v42  ;;  %v97_v51 = vsel %vm96_vm3, %v91_v41, %v87_v43 }
  0xc1   :  { %v133_v44 = vpop.xlane.xlu1 %132  ;;  %v78_v45 = vpop.xlane.xlu0 %77 }
  0xc2   :  { %v148_v47 = vrot.slane %v133_v44, %v86_v37  ;;  %v95_v49 = vrot.slane %v78_v45, %v86_v37 }
  0xc4   :  { %v150_v52 = vsel %vm98_vm4, %v148_v47, %v149_v50  ;;  %v99_v53 = vsel %vm98_vm4, %v95_v49, %v97_v51 }
  0xc5   :  { %v152_v54 = vadd.f32 %v150_v52, %v109_v46  ;;  %v101_v55 = vadd.f32 %v99_v53, %v53_v48 }
  0xc7   :  { %153 = vst.msk [vmem:[#allocation2 + $0x4] sm:$0x7] %vm47_vm1, %v152_v54  ;;  %103 = vst.msk [vmem:[#allocation2] sm:$0x7] %vm47_vm1, %v101_v55 }
  0xce   :  { %v159_v56 = vld [vmem:[#allocation2] sm:$0x7]  ;;  %v254_v57 = vld [vmem:[#allocation2 + $0x4] sm:$0x7] }
  0xcf   :  { %v160_v58 = vmul.f32 0.00390625, %v159_v56  ;;  %v255_v59 = vmul.f32 0.00390625, %v254_v57 }
  0xd1   :  { %375 = vmatmul.mubr.msk.f32.vlgmr.msra.gmra.mrb[0].mxu0 %vm167_vm5, %v160_v58  ;;  %380 = vmatmul.mubr.msk.f32.vlgmr.msra.gmra.mrb[0].mxu1 %vm167_vm5, %v255_v59 }
 0x1a4   :  { %v240_v61 = vpop.f32.mrb[0].mxu0  ;;  %v325_v62 = vpop.f32.mrb[0].mxu1 }
 0x1a5   :  { %v241_v63 = vadd.f32 %v362_v60, %v240_v61  ;;  %v326_v0 = vadd.f32 %v362_v60, %v325_v62  ;;  %v376_v1 = vpop.f32.mrb[1].mxu0  ;;  %v381_v2 = vpop.f32.mrb[1].mxu1 }
 0x1a7   :  { %244 = vst [vmem:[%s570_s4] sm:$0x7] %v241_v63  ;;  %v246_v3 = vsel %vm245_vm6, %v241_v63, -inf  ;;  %367 = vst [vmem:[%s570_s4 + $0x4] sm:$0x7] %v326_v0  ;;  %v331_v4 = vsel %vm245_vm6, %v326_v0, -inf }
 0x1a8   :  { %v247_v5 = vrot.slane %v246_v3, 4  ;;  %v332_v6 = vrot.slane %v331_v4, 4 }
 0x1aa   :  { %v248_v7 = vmax.f32 %v246_v3, %v247_v5  ;;  %v333_v8 = vmax.f32 %v331_v4, %v332_v6 }
 0x1ac   :  { %v249_v9 = vrot.slane %v248_v7, 2  ;;  %v334_v10 = vrot.slane %v333_v8, 2 }
 0x1ae   :  { %v250_v11 = vmax.f32 %v248_v7, %v249_v9  ;;  %v335_v12 = vmax.f32 %v333_v8, %v334_v10 }
 0x1b0   :  { %v251_v13 = vrot.slane %v250_v11, 1  ;;  %v336_v14 = vrot.slane %v335_v12, 1 }
 0x1b2   :  { %v252_v15 = vmax.f32 %v250_v11, %v251_v13  ;;  %v337_v16 = vmax.f32 %v335_v12, %v336_v14 }
 0x1b4   :  { %253 = vst [vmem:[#allocation8] sm:$0x1] %v252_v15  ;;  %339 = vst [vmem:[#allocation8 + $0x1] sm:$0x1] %v337_v16 }
 0x1b5   :  { %452 = shalt.err (!%p449_p6)
}
 0x1b6   :  { %s453_s22 = scalar_lea.hbm %s569_s3, 32 }
 0x1b7   :  { %p454_p7 = scmp.ne.s32.totalorder %s569_s3, %s453_s22  ;;  %p457_p8 = scmp.lt.u32.totalorder %s453_s22, %s569_s3 }
 0x1b9   :  { %p459_p9 = pnand %p457_p8, %p454_p7 }
 0x1bb   :  { %462 = shalt.err (!%p459_p9)
}
 0x1bc   :  { %s476_s27 = smov 16   ;;  %s477_s28 = smov 1  }
 0x1bd   :  { %351 = dma.vmem_to_hbm [thread:$0]  %s346_s19, 32, %s569_s3, [#allocation5], %s476_s27, %s476_s27, %s477_s28  }
 0x1be   :  { %467 = dma.done.wait [#allocation5], 32  }
 0x1bf   :  { %468 = vsyncadd [#allocation5], 4294967264 }
 0x1c0   :  { %359 = vsyncpa [#allocation4], 1 }
 0x1c1   :  { %360 = vsyncpa [#allocation7], 1 }
 0x1c2   :  { %361 = vsyncpa [#allocation5], 1 }

</bundles_post_ra>
